<compile_context>
chip_gen: v7x
topology: tpu7x:2x2x1
jax: 0.10.0
libtpu: 0.0.40
codegen_flags: <defaults>
</compile_context>

<pallas_src>
import functools
import jax
import jax.numpy as jnp
from jax.experimental import pallas as pl
from jax.experimental.pallas import tpu as pltpu

# FS-coding constants from the module's __init__ defaults.
K_STEPS = 5
D_VALS = (1.5, 0.75, 0.3725, 0.18625, 0.093125)

_LANE = 128
_FS_WIDTH = 512           # lane-dense FS tile width (4 vregs wide)
_Q_DTYPE = jnp.bfloat16   # MXU-native operand dtype


def _round_up(x, m):
    return (x + m - 1) // m * m


def _vmem_budget_bytes():
    """Per-kernel VMEM working-set budget, sized from the actual chip.

    v7x has 64 MiB per TensorCore, v5e/v6e have 128 MiB; keep ~1/3 of capacity so Mosaic
    scratch / pipeline slack always fit."""
    try:
        cap = int(pltpu.get_tpu_info().vmem_capacity_bytes)
    except Exception:
        cap = 64 << 20  # conservative (v7x-sized) fallback
    return int(min(max(cap // 3, 12 << 20), 40 << 20))


# --------------------------------------------------------------------------
# Kernel 1: FS coding, fused over the K steps (elementwise hot path).
# --------------------------------------------------------------------------
def _fs_fused_kernel(x_ref, q_ref, psum_ref):
    """Per element: z_t = (c > D[t]), c -= D[t]*z_t.

    Emits q = sum_t D[t]*z_t in bf16 (conv(q) == sum_t D[t]*conv(z_t) by linearity) plus the
    per-tile spike count as a lane-dense (8,128) broadcast block (reduced in the wrapper).
    Spike counting uses a vector accumulator -> one cross-lane reduction per tile."""
    c = x_ref[...]
    q = jnp.zeros_like(c)
    cnt = jnp.zeros_like(c)
    for step in range(K_STEPS):
        d = jnp.float32(D_VALS[step])
        z = (c > d).astype(jnp.float32)
        c = c - d * z
        q = q + d * z
        cnt = cnt + z
    q_ref[...] = q.astype(q_ref.dtype)
    psum_ref[...] = jnp.zeros(psum_ref.shape, psum_ref.dtype) + jnp.sum(cnt)


def _fs_coding(x_flat, tile_rows=512):
    """x_flat: (T,) f32 -> (q_flat (T,) bf16, total spike count scalar f32)."""
    t = x_flat.shape[0]
    rows = pl.cdiv(t, _FS_WIDTH)
    # tile_r multiple of 16 so the bf16 q block is sublane-aligned to (16,128) packing.
    tile_r = min(_round_up(tile_rows, 16), _round_up(rows, 16))
    rows_pad = _round_up(rows, tile_r)
    num_tiles = rows_pad // tile_r
    t_pad = rows_pad * _FS_WIDTH
    # Zero padding is safe: 0 never exceeds any threshold, so padded elements contribute
    # nothing to q or to the spike count.
    xp = jnp.pad(x_flat, (0, t_pad - t)).reshape(rows_pad, _FS_WIDTH)

    q, psums = pl.pallas_call(
        _fs_fused_kernel,
        grid=(num_tiles,),
        in_specs=[pl.BlockSpec((tile_r, _FS_WIDTH), lambda i: (i, 0))],
        out_specs=(pl.BlockSpec((tile_r, _FS_WIDTH), lambda i: (i, 0)),
                   pl.BlockSpec((8, _LANE), lambda i: (i, 0))),
        out_shape=(jax.ShapeDtypeStruct((rows_pad, _FS_WIDTH), _Q_DTYPE),
                   jax.ShapeDtypeStruct((num_tiles * 8, _LANE), jnp.float32)),
        compiler_params=pltpu.CompilerParams(
            dimension_semantics=("parallel",)),
    )(xp)
    spike_total = jnp.sum(psums.reshape(num_tiles, 8, _LANE)[:, 0, 0])
    return q.reshape(-1)[:t], spike_total


# --------------------------------------------------------------------------
# Kernel 2: conv as a tiled im2col matmul (MXU hot path, bf16 in / f32 acc).
# --------------------------------------------------------------------------
def _conv_matmul_kernel(patch_ref, w_ref, out_ref):
    out_ref[...] = jnp.dot(patch_ref[...], w_ref[...],
                           preferred_element_type=jnp.float32)


def _pick_tiles(rows, p_pad, c2p, budget, target_tm=512):
    """Choose (tm, tn) so the double-buffered working set (bf16 LHS + bf16 weight tile +
    f32 out tile) stays inside `budget`."""
    # N tile: keep the (double-buffered) bf16 weight tile within ~1/3 of the budget.
    max_tn = ((budget // 3) // (2 * 2 * p_pad)) // _LANE * _LANE
    tn = int(min(c2p, max(_LANE, max_tn)))
    # M tile: spend the rest on double-buffered bf16 LHS rows + f32 output rows.
    avail = budget - 2 * 2 * p_pad * tn
    per_row = 2 * (2 * p_pad + 4 * tn)
    cap = max(avail // per_row, 16)
    tm = int(min(target_tm, cap, _round_up(rows, 16)))
    tm = max(16, (tm // 16) * 16)
    return tm, tn


def _conv_matmul(patches, wmat, target_tm=512):
    rows, p_pad = patches.shape
    c2p = wmat.shape[1]
    budget = _vmem_budget_bytes()
    tm, tn = _pick_tiles(rows, p_pad, c2p, budget, target_tm)

    # No row padding: grid uses cdiv and Pallas masks the ragged boundary block.
    # N is the inner axis so the (large) patch tile stays resident across weight tiles.
    grid = (pl.cdiv(rows, tm), pl.cdiv(c2p, tn))
    return pl.pallas_call(
        _conv_matmul_kernel,
        grid=grid,
        in_specs=[pl.BlockSpec((tm, p_pad), lambda i, j: (i, 0)),
                  pl.BlockSpec((p_pad, tn), lambda i, j: (0, j))],
        out_specs=pl.BlockSpec((tm, tn), lambda i, j: (i, j)),
        out_shape=jax.ShapeDtypeStruct((rows, c2p), jnp.float32),
        compiler_params=pltpu.CompilerParams(
            dimension_semantics=("parallel", "parallel"),
            vmem_limit_bytes=int(min(budget + (8 << 20), 64 << 20))),
    )(patches, wmat)


# --------------------------------------------------------------------------
# Layout glue (XLA): NHWC im2col on the single fused q tensor.
# --------------------------------------------------------------------------
def _im2col_nhwc(x, k, s, p, p_pad):
    """x: (N, H, W, C) -> (N*Ho*Wo, p_pad); column order (kh, kw, c), channels lane-contiguous
    (no 9x-expanded transpose).  Extra zero columns pad C*k*k up to p_pad inside the concat."""
    n, h, w, c = x.shape
    ho = (h + 2 * p - k) // s + 1
    wo = (w + 2 * p - k) // s + 1
    xp = jnp.pad(x, ((0, 0), (p, p), (p, p), (0, 0)))
    cols = []
    for di in range(k):
        for dj in range(k):
            cols.append(xp[:, di:di + s * ho:s, dj:dj + s * wo:s, :])
    if p_pad > k * k * c:
        cols.append(jnp.zeros((n, ho, wo, p_pad - k * k * c), x.dtype))
    patches = jnp.concatenate(cols, axis=-1).reshape(n * ho * wo, p_pad)
    return patches, ho, wo


def conv_forward(x, weight, k, s, p, *, fs_tile_rows=512, conv_tile_rows=512):
    """Forward pass of Conv: returns (c_out [NCHW f32], c_spikes.sum(), c_spike.numel())."""
    B, C1, H, W = x.shape
    C2 = weight.shape[0]

    # NHWC layout so im2col needs no 9x transpose and channels sit on the lane axis.
    x_nhwc = jnp.transpose(x, (0, 2, 3, 1))

    # ---- FS coding fused over the K steps (one elementwise pass, emits bf16 q) ----
    q_flat, spike_total = _fs_coding(x_nhwc.reshape(-1), fs_tile_rows)
    q = q_flat.reshape(B, H, W, C1)

    # ---- im2col on the single fused tensor; pad P to a multiple of 16 (bf16 sublane) ----
    P = C1 * k * k
    P_pad = _round_up(P, 16)
    patches, Ho, Wo = _im2col_nhwc(q, k, s, p, P_pad)          # (B*Ho*Wo, P_pad) bf16

    # ---- lane-dense bf16 weight: (kh, kw, c) rows, C2 padded to a multiple of 128 ----
    C2p = _round_up(C2, _LANE)
    wmat = jnp.transpose(weight, (2, 3, 1, 0)).reshape(P, C2)   # (C1*k*k, C2)
    wmat = jnp.pad(wmat, ((0, P_pad - P), (0, C2p - C2))).astype(_Q_DTYPE)

    # ---- single tiled matmul on the MXU (bf16 x bf16 -> f32) ----
    out_flat = _conv_matmul(patches, wmat, conv_tile_rows)      # (B*Ho*Wo, C2p) f32
    c_out = out_flat[:, :C2].reshape(B, Ho, Wo, C2).transpose(0, 3, 1, 2)  # NCHW

    c_spike_numel = B * C1 * H * W
    return c_out, spike_total, c_spike_numel


# --------------------------------------------------------------------------
# Pure-JAX reference mirroring the PyTorch forward (per-step f32 convs).
# --------------------------------------------------------------------------
def _reference(x, weight, k, s, p):
    B, C1, H, W = x.shape
    c = x
    c_spikes = jnp.zeros_like(x)
    Ho = (H + 2 * p - k) // s + 1
    Wo = (W + 2 * p - k) // s + 1
    c_out = jnp.zeros((B, weight.shape[0], Ho, Wo), jnp.float32)
    z = None
    for step in range(K_STEPS):
        d = D_VALS[step]
        z = (c > d).astype(jnp.float32)
        c = c - d * z
        c_spikes = c_spikes + z
        y = jax.lax.conv_general_dilated(
            z, weight, (s, s), [(p, p), (p, p)],
            dimension_numbers=("NCHW", "OIHW", "NCHW"),
            precision=jax.lax.Precision.HIGHEST)
        c_out = c_out + y * d
    return c_out, c_spikes.sum(), z.size


if __name__ == "__main__":
    # Small shapes consistent with the module: Conv(c1=4, c2=8, k=3, s=1, p=1)
    B, C1, C2, H, W = 2, 4, 8, 16, 16
    k, s, p = 3, 1, 1

    key = jax.random.PRNGKey(0)
    kx, kw = jax.random.split(key)
    # Positive inputs spanning the thresholds so spikes fire at every step.
    x = jax.random.uniform(kx, (B, C1, H, W), jnp.float32, minval=0.0, maxval=3.0)
    weight = jax.random.normal(kw, (C2, C1, k, k), jnp.float32) * 0.1

    fwd = jax.jit(functools.partial(conv_forward, k=k, s=s, p=p))
    c_out, spikes_sum, numel = fwd(x, weight)
    jax.block_until_ready(c_out)

    ref_out, ref_sum, ref_numel = _reference(x, weight, k, s, p)
    assert int(numel) == int(ref_numel)
    # Spike counting is pure f32 (identical op sequence) -> matches exactly.
    assert jnp.allclose(spikes_sum, ref_sum), (spikes_sum, ref_sum)
    # Conv runs with bf16 operands / f32 accumulation -> slightly looser tolerance vs the
    # f32 HIGHEST-precision reference.
    assert jnp.allclose(c_out, ref_out, rtol=2e-2, atol=3e-2), \
        float(jnp.max(jnp.abs(c_out - ref_out)))
    print("KERNEL_OK")
</pallas_src>

<mosaic_0001>
module attributes {stable_mosaic.version = 11 : i64} {
  func.func @_fs_fused_kernel(%arg0: i32, %arg1: memref<16x512xf32, #tpu.memory_space<vmem>>, %arg2: memref<16x512xbf16, #tpu.memory_space<vmem>>, %arg3: memref<8x128xf32, #tpu.memory_space<vmem>>) attributes {dimension_semantics = [#tpu.dimension_semantics<parallel>], iteration_bounds = array<i64: 1>, scalar_prefetch = 0 : i64, scratch_operands = 0 : i64, tpu.core_type = #tpu.core_type<tc>, window_params = [{transform_indices = @transform_0, window_bounds = array<i64: 16, 512>}, {transform_indices = @transform_1, window_bounds = array<i64: 16, 512>}, {transform_indices = @transform_2, window_bounds = array<i64: 8, 128>}]} {
    %c0 = arith.constant 0 : index
    %c0_0 = arith.constant 0 : index
    %0 = vector.load %arg1[%c0, %c0_0] : memref<16x512xf32, #tpu.memory_space<vmem>>, vector<16x512xf32>
    %cst = arith.constant 0.000000e+00 : f32
    %1 = vector.broadcast %cst : f32 to vector<16x512xf32>
    %cst_1 = arith.constant 0.000000e+00 : f32
    %2 = vector.broadcast %cst_1 : f32 to vector<16x512xf32>
    %cst_2 = arith.constant 1.500000e+00 : f32
    %3 = vector.broadcast %cst_2 : f32 to vector<16x512xf32>
    %4 = arith.cmpf ogt, %0, %3 : vector<16x512xf32>
    %5 = arith.extui %4 : vector<16x512xi1> to vector<16x512xi32>
    %6 = arith.sitofp %5 : vector<16x512xi32> to vector<16x512xf32>
    %cst_3 = arith.constant 1.500000e+00 : f32
    %7 = vector.broadcast %cst_3 : f32 to vector<16x512xf32>
    %8 = arith.mulf %7, %6 : vector<16x512xf32>
    %9 = arith.subf %0, %8 : vector<16x512xf32>
    %cst_4 = arith.constant 1.500000e+00 : f32
    %10 = vector.broadcast %cst_4 : f32 to vector<16x512xf32>
    %11 = arith.mulf %10, %6 : vector<16x512xf32>
    %12 = arith.addf %1, %11 : vector<16x512xf32>
    %13 = arith.addf %2, %6 : vector<16x512xf32>
    %cst_5 = arith.constant 7.500000e-01 : f32
    %14 = vector.broadcast %cst_5 : f32 to vector<16x512xf32>
    %15 = arith.cmpf ogt, %9, %14 : vector<16x512xf32>
    %16 = arith.extui %15 : vector<16x512xi1> to vector<16x512xi32>
    %17 = arith.sitofp %16 : vector<16x512xi32> to vector<16x512xf32>
    %cst_6 = arith.constant 7.500000e-01 : f32
    %18 = vector.broadcast %cst_6 : f32 to vector<16x512xf32>
    %19 = arith.mulf %18, %17 : vector<16x512xf32>
    %20 = arith.subf %9, %19 : vector<16x512xf32>
    %cst_7 = arith.constant 7.500000e-01 : f32
    %21 = vector.broadcast %cst_7 : f32 to vector<16x512xf32>
    %22 = arith.mulf %21, %17 : vector<16x512xf32>
    %23 = arith.addf %12, %22 : vector<16x512xf32>
    %24 = arith.addf %13, %17 : vector<16x512xf32>
    %cst_8 = arith.constant 3.725000e-01 : f32
    %25 = vector.broadcast %cst_8 : f32 to vector<16x512xf32>
    %26 = arith.cmpf ogt, %20, %25 : vector<16x512xf32>
    %27 = arith.extui %26 : vector<16x512xi1> to vector<16x512xi32>
    %28 = arith.sitofp %27 : vector<16x512xi32> to vector<16x512xf32>
    %cst_9 = arith.constant 3.725000e-01 : f32
    %29 = vector.broadcast %cst_9 : f32 to vector<16x512xf32>
    %30 = arith.mulf %29, %28 : vector<16x512xf32>
    %31 = arith.subf %20, %30 : vector<16x512xf32>
    %cst_10 = arith.constant 3.725000e-01 : f32
    %32 = vector.broadcast %cst_10 : f32 to vector<16x512xf32>
    %33 = arith.mulf %32, %28 : vector<16x512xf32>
    %34 = arith.addf %23, %33 : vector<16x512xf32>
    %35 = arith.addf %24, %28 : vector<16x512xf32>
    %cst_11 = arith.constant 1.862500e-01 : f32
    %36 = vector.broadcast %cst_11 : f32 to vector<16x512xf32>
    %37 = arith.cmpf ogt, %31, %36 : vector<16x512xf32>
    %38 = arith.extui %37 : vector<16x512xi1> to vector<16x512xi32>
    %39 = arith.sitofp %38 : vector<16x512xi32> to vector<16x512xf32>
    %cst_12 = arith.constant 1.862500e-01 : f32
    %40 = vector.broadcast %cst_12 : f32 to vector<16x512xf32>
    %41 = arith.mulf %40, %39 : vector<16x512xf32>
    %42 = arith.subf %31, %41 : vector<16x512xf32>
    %cst_13 = arith.constant 1.862500e-01 : f32
    %43 = vector.broadcast %cst_13 : f32 to vector<16x512xf32>
    %44 = arith.mulf %43, %39 : vector<16x512xf32>
    %45 = arith.addf %34, %44 : vector<16x512xf32>
    %46 = arith.addf %35, %39 : vector<16x512xf32>
    %cst_14 = arith.constant 9.312500e-02 : f32
    %47 = vector.broadcast %cst_14 : f32 to vector<16x512xf32>
    %48 = arith.cmpf ogt, %42, %47 : vector<16x512xf32>
    %49 = arith.extui %48 : vector<16x512xi1> to vector<16x512xi32>
    %50 = arith.sitofp %49 : vector<16x512xi32> to vector<16x512xf32>
    %cst_15 = arith.constant 9.312500e-02 : f32
    %51 = vector.broadcast %cst_15 : f32 to vector<16x512xf32>
    %52 = arith.mulf %51, %50 : vector<16x512xf32>
    %53 = arith.addf %45, %52 : vector<16x512xf32>
    %54 = arith.addf %46, %50 : vector<16x512xf32>
    %55 = arith.truncf %53 : vector<16x512xf32> to vector<16x512xbf16>
    %c0_16 = arith.constant 0 : index
    %c0_17 = arith.constant 0 : index
    %56 = vector.load %arg2[%c0_16, %c0_17] : memref<16x512xbf16, #tpu.memory_space<vmem>>, vector<16x512xbf16>
    tpu.vector_store %arg2[%c0_16, %c0_17], %55 {strides = array<i32>} : memref<16x512xbf16, #tpu.memory_space<vmem>>, vector<16x512xbf16>,
    %cst_18 = arith.constant 0.000000e+00 : f32
    %57 = vector.broadcast %cst_18 : f32 to vector<8x128xf32>
    %58 = vector.shape_cast %54 : vector<16x512xf32> to vector<1x16x512xf32>
    %cst_19 = arith.constant dense<0.000000e+00> : vector<1xf32>
    %59 = vector.multi_reduction <add>, %58, %cst_19 [1, 2] : vector<1x16x512xf32> to vector<1xf32>
    %60 = vector.shape_cast %59 : vector<1xf32> to vector<1x1x1xf32>
    %61 = vector.extract %60[0, 0, 0] : f32 from vector<1x1x1xf32>
    %62 = vector.broadcast %61 : f32 to vector<8x128xf32>
    %63 = arith.addf %57, %62 : vector<8x128xf32>
    %c0_20 = arith.constant 0 : index
    %c0_21 = arith.constant 0 : index
    %64 = vector.load %arg3[%c0_20, %c0_21] : memref<8x128xf32, #tpu.memory_space<vmem>>, vector<8x128xf32>
    tpu.vector_store %arg3[%c0_20, %c0_21], %63 {strides = array<i32>} : memref<8x128xf32, #tpu.memory_space<vmem>>, vector<8x128xf32>,
    return
  }
  func.func @transform_0(%arg0: i32) -> (i32, i32) {
    %c0_i32 = arith.constant 0 : i32
    %c0_i32_0 = arith.constant 0 : i32
    return %arg0, %c0_i32 : i32, i32
  }
  func.func @transform_1(%arg0: i32) -> (i32, i32) {
    %c0_i32 = arith.constant 0 : i32
    %c0_i32_0 = arith.constant 0 : i32
    return %arg0, %c0_i32 : i32, i32
  }
  func.func @transform_2(%arg0: i32) -> (i32, i32) {
    %c0_i32 = arith.constant 0 : i32
    %c0_i32_0 = arith.constant 0 : i32
    return %arg0, %c0_i32 : i32, i32
  }
}

module attributes {stable_mosaic.version = 11 : i64} {
  func.func @_conv_matmul_kernel(%arg0: i32, %arg1: i32, %arg2: memref<512x48xbf16, #tpu.memory_space<vmem>>, %arg3: memref<48x128xbf16, #tpu.memory_space<vmem>>, %arg4: memref<512x128xf32, #tpu.memory_space<vmem>>) attributes {dimension_semantics = [#tpu.dimension_semantics<parallel>, #tpu.dimension_semantics<parallel>], iteration_bounds = array<i64: 1, 1>, scalar_prefetch = 0 : i64, scratch_operands = 0 : i64, tpu.core_type = #tpu.core_type<tc>, window_params = [{transform_indices = @transform_0, window_bounds = array<i64: 512, 48>}, {transform_indices = @transform_1, window_bounds = array<i64: 48, 128>}, {transform_indices = @transform_2, window_bounds = array<i64: 512, 128>}]} {
    %c0 = arith.constant 0 : index
    %c0_0 = arith.constant 0 : index
    %0 = vector.load %arg2[%c0, %c0_0] : memref<512x48xbf16, #tpu.memory_space<vmem>>, vector<512x48xbf16>
    %c0_1 = arith.constant 0 : index
    %c0_2 = arith.constant 0 : index
    %1 = vector.load %arg3[%c0_1, %c0_2] : memref<48x128xbf16, #tpu.memory_space<vmem>>, vector<48x128xbf16>
    %cst = arith.constant dense<0.000000e+00> : vector<512x128xf32>
    %2 = tpu.matmul %0, %1, %cst {dimension_numbers = #tpu.dot_dimension_numbers<[1], [0], [0], [1], [0, 0, 1, 1], [], []>} : vector<512x48xbf16>, vector<48x128xbf16>, vector<512x128xf32> -> vector<512x128xf32>
    %c0_3 = arith.constant 0 : index
    %c0_4 = arith.constant 0 : index
    %3 = vector.load %arg4[%c0_3, %c0_4] : memref<512x128xf32, #tpu.memory_space<vmem>>, vector<512x128xf32>
    tpu.vector_store %arg4[%c0_3, %c0_4], %2 {strides = array<i32>} : memref<512x128xf32, #tpu.memory_space<vmem>>, vector<512x128xf32>,
    return
  }
  func.func @transform_0(%arg0: i32, %arg1: i32) -> (i32, i32) {
    %c0_i32 = arith.constant 0 : i32
    %c0_i32_0 = arith.constant 0 : i32
    return %arg0, %c0_i32 : i32, i32
  }
  func.func @transform_1(%arg0: i32, %arg1: i32) -> (i32, i32) {
    %c0_i32 = arith.constant 0 : i32
    %c0_i32_0 = arith.constant 0 : i32
    return %c0_i32, %arg1 : i32, i32
  }
  func.func @transform_2(%arg0: i32, %arg1: i32) -> (i32, i32) {
    %c0_i32 = arith.constant 0 : i32
    return %arg0, %arg1 : i32, i32
  }
}

</mosaic_0001>

<bundles_post_ra>
// kernel: conv_forward.2
= control target key start
LH: loop header
LB: loop body
LE: loop exit
PB: predicated region body
PF: predicated region fallthrough
CT: control target
= control target key end

     0   :  { %v396_v8 = vmov 0.0   ;;  %s609_s0 = inlined_call_operand.vmem [shape: f32[16,512], index: 0, kind: input, shape index: {}]   ;;  %s610_s1 = inlined_call_operand.vmem [shape: bf16[16,512], index: 1, kind: output, shape index: {0}]   ;;  %s611_s2 = inlined_call_operand.vmem [shape: f32[8,128], index: 2, kind: output, shape index: {1}]  }
   0x1   :  { %v10_v0 = vld [vmem:[%s609_s0] sm:$0xff]  ;;  %v11_v1 = vld [vmem:[%s609_s0 + $0x8] sm:$0xff]  ;;  %v12_v2 = vld [vmem:[%s609_s0 + $0x10] sm:$0xff] }
   0x2   :  { %v13_v3 = vld [vmem:[%s609_s0 + $0x18] sm:$0xff]  ;;  %v14_v4 = vld [vmem:[%s609_s0 + $0x20] sm:$0xff]  ;;  %v15_v5 = vld [vmem:[%s609_s0 + $0x28] sm:$0xff]  ;;  %vm18_vm0 = vcmp.gt.f32.partialorder %v10_v0, 1.5  ;;  %vm19_vm1 = vcmp.gt.f32.partialorder %v11_v1, 1.5  ;;  %vm20_vm2 = vcmp.gt.f32.partialorder %v12_v2, 1.5 }
   0x3   :  { %v16_v6 = vld [vmem:[%s609_s0 + $0x30] sm:$0xff]  ;;  %v17_v7 = vld [vmem:[%s609_s0 + $0x38] sm:$0xff]  ;;  %vm21_vm3 = vcmp.gt.f32.partialorder %v13_v3, 1.5  ;;  %vm22_vm4 = vcmp.gt.f32.partialorder %v14_v4, 1.5  ;;  %vm23_vm5 = vcmp.gt.f32.partialorder %v15_v5, 1.5  ;;  %v437_v9 = vsel %vm18_vm0, 1.0, %v396_v8 }
   0x4   :  { %vm24_vm6 = vcmp.gt.f32.partialorder %v16_v6, 1.5  ;;  %vm25_vm7 = vcmp.gt.f32.partialorder %v17_v7, 1.5  ;;  %v440_v10 = vsel %vm19_vm1, 1.0, %v396_v8  ;;  %v443_v11 = vsel %vm20_vm2, 1.0, %v396_v8 }
   0x5   :  { %v446_v12 = vsel %vm21_vm3, 1.0, %v396_v8  ;;  %v449_v13 = vsel %vm22_vm4, 1.0, %v396_v8  ;;  %v452_v14 = vsel %vm23_vm5, 1.0, %v396_v8  ;;  %v455_v15 = vsel %vm24_vm6, 1.0, %v396_v8 }
   0x6   :  { %v458_v16 = vsel %vm25_vm7, 1.0, %v396_v8  ;;  %v42_v17 = vmul.f32 1.5, %v437_v9  ;;  %v43_v18 = vmul.f32 1.5, %v440_v10  ;;  %v44_v19 = vmul.f32 1.5, %v443_v11 }
   0x7   :  { %v45_v20 = vmul.f32 1.5, %v446_v12  ;;  %v46_v21 = vmul.f32 1.5, %v449_v13  ;;  %v47_v22 = vmul.f32 1.5, %v452_v14  ;;  %v467_v23 = vmul.f32 1.5, %v455_v15 }
   0x8   :  { %v470_v24 = vmul.f32 1.5, %v458_v16  ;;  %v50_v25 = vsub.f32 %v10_v0, %v42_v17  ;;  %v51_v26 = vsub.f32 %v11_v1, %v43_v18  ;;  %v52_v27 = vsub.f32 %v12_v2, %v44_v19 }
   0x9   :  { %v53_v28 = vsub.f32 %v13_v3, %v45_v20  ;;  %v54_v29 = vsub.f32 %v14_v4, %v46_v21  ;;  %v55_v30 = vsub.f32 %v15_v5, %v47_v22  ;;  %v56_v31 = vsub.f32 %v16_v6, %v467_v23 }
   0xa   :  { %v57_v32 = vsub.f32 %v17_v7, %v470_v24  ;;  %vm74_vm8 = vcmp.gt.f32.partialorder %v50_v25, 0.75  ;;  %vm75_vm9 = vcmp.gt.f32.partialorder %v51_v26, 0.75  ;;  %vm76_vm10 = vcmp.gt.f32.partialorder %v52_v27, 0.75 }
   0xb   :  { %vm77_vm11 = vcmp.gt.f32.partialorder %v53_v28, 0.75  ;;  %vm78_vm12 = vcmp.gt.f32.partialorder %v54_v29, 0.75  ;;  %vm79_vm13 = vcmp.gt.f32.partialorder %v55_v30, 0.75  ;;  %vm80_vm14 = vcmp.gt.f32.partialorder %v56_v31, 0.75 }
   0xc   :  { %vm81_vm15 = vcmp.gt.f32.partialorder %v57_v32, 0.75  ;;  %v353_v33 = vsel %vm74_vm8, 1.0, %v396_v8  ;;  %v354_v34 = vsel %vm75_vm9, 1.0, %v396_v8  ;;  %v355_v35 = vsel %vm76_vm10, 1.0, %v396_v8 }
   0xd   :  { %v356_v36 = vsel %vm77_vm11, 1.0, %v396_v8  ;;  %v357_v37 = vsel %vm78_vm12, 1.0, %v396_v8  ;;  %v358_v38 = vsel %vm79_vm13, 1.0, %v396_v8  ;;  %v359_v39 = vsel %vm80_vm14, 1.0, %v396_v8 }
   0xe   :  { %v360_v40 = vsel %vm81_vm15, 1.0, %v396_v8  ;;  %v98_v41 = vmul.f32 0.75, %v353_v33  ;;  %v99_v42 = vmul.f32 0.75, %v354_v34  ;;  %v100_v43 = vmul.f32 0.75, %v355_v35 }
   0xf   :  { %v101_v44 = vmul.f32 0.75, %v356_v36  ;;  %v102_v45 = vmul.f32 0.75, %v357_v37  ;;  %v103_v46 = vmul.f32 0.75, %v358_v38  ;;  %v104_v47 = vmul.f32 0.75, %v359_v39 }
  0x10   :  { %v105_v48 = vmul.f32 0.75, %v360_v40  ;;  %v106_v49 = vsub.f32 %v50_v25, %v98_v41  ;;  %v107_v50 = vsub.f32 %v51_v26, %v99_v42  ;;  %v108_v51 = vsub.f32 %v52_v27, %v100_v43 }
  0x11   :  { %v109_v52 = vsub.f32 %v53_v28, %v101_v44  ;;  %v110_v53 = vsub.f32 %v54_v29, %v102_v45  ;;  %v111_v54 = vsub.f32 %v55_v30, %v103_v46  ;;  %v112_v55 = vsub.f32 %v56_v31, %v104_v47 }
  0x12   :  { %v113_v56 = vsub.f32 %v57_v32, %v105_v48  ;;  %v114_v57 = vadd.f32 %v98_v41, %v42_v17  ;;  %v115_v58 = vadd.f32 %v99_v42, %v43_v18  ;;  %v116_v59 = vadd.f32 %v100_v43, %v44_v19 }
  0x13   :  { %v117_v60 = vadd.f32 %v101_v44, %v45_v20  ;;  %v118_v61 = vadd.f32 %v102_v45, %v46_v21  ;;  %vm130_vm0 = vcmp.gt.f32.partialorder %v106_v49, 0.3725  ;;  %vm131_vm1 = vcmp.gt.f32.partialorder %v107_v50, 0.3725 }
  0x14   :  { %vm132_vm2 = vcmp.gt.f32.partialorder %v108_v51, 0.3725  ;;  %v119_v62 = vadd.f32 %v103_v46, %v47_v22  ;;  %vm133_vm3 = vcmp.gt.f32.partialorder %v109_v52, 0.3725  ;;  %vm134_vm4 = vcmp.gt.f32.partialorder %v110_v53, 0.3725 }
  0x15   :  { %vm135_vm5 = vcmp.gt.f32.partialorder %v111_v54, 0.3725  ;;  %vm136_vm6 = vcmp.gt.f32.partialorder %v112_v55, 0.3725  ;;  %vm137_vm7 = vcmp.gt.f32.partialorder %v113_v56, 0.3725  ;;  %v120_v18 = vadd.f32 %v104_v47, %v467_v23 }
  0x16   :  { %v361_v63 = vsel %vm130_vm0, 1.0, %v396_v8  ;;  %v362_v0 = vsel %vm131_vm1, 1.0, %v396_v8  ;;  %v485_v1 = vsel %vm132_vm2, 1.0, %v396_v8  ;;  %v488_v2 = vsel %vm133_vm3, 1.0, %v396_v8 }
  0x17   :  { %v491_v3 = vsel %vm134_vm4, 1.0, %v396_v8  ;;  %v494_v4 = vsel %vm135_vm5, 1.0, %v396_v8  ;;  %v497_v5 = vsel %vm136_vm6, 1.0, %v396_v8  ;;  %v500_v6 = vsel %vm137_vm7, 1.0, %v396_v8 }
  0x18   :  { %v154_v7 = vmul.f32 0.3725, %v361_v63  ;;  %v155_v17 = vmul.f32 0.3725, %v362_v0  ;;  %v156_v19 = vmul.f32 0.3725, %v485_v1  ;;  %v121_v22 = vadd.f32 %v105_v48, %v470_v24 }
  0x19   :  { %v157_v20 = vmul.f32 0.3725, %v488_v2  ;;  %v158_v21 = vmul.f32 0.3725, %v491_v3  ;;  %v159_v25 = vmul.f32 0.3725, %v494_v4  ;;  %v122_v28 = vadd.f32 %v353_v33, %v437_v9 }
  0x1a   :  { %v160_v26 = vmul.f32 0.3725, %v497_v5  ;;  %v161_v27 = vmul.f32 0.3725, %v500_v6  ;;  %v123_v29 = vadd.f32 %v354_v34, %v440_v10  ;;  %v124_v23 = vadd.f32 %v355_v35, %v443_v11 }
  0x1b   :  { %v125_v30 = vadd.f32 %v356_v36, %v446_v12  ;;  %v126_v31 = vadd.f32 %v357_v37, %v449_v13  ;;  %v127_v32 = vadd.f32 %v358_v38, %v452_v14  ;;  %v516_v41 = vsub.f32 %v106_v49, %v154_v7 }
  0x1c   :  { %v518_v24 = vsub.f32 %v107_v50, %v155_v17  ;;  %v521_v42 = vadd.f32 %v359_v39, %v455_v15  ;;  %v523_v43 = vsub.f32 %v108_v51, %v156_v19  ;;  %v525_v9 = vsub.f32 %v109_v52, %v157_v20 }
  0x1d   :  { %v527_v10 = vsub.f32 %v110_v53, %v158_v21  ;;  %v530_v11 = vadd.f32 %v360_v40, %v458_v16  ;;  %v532_v12 = vsub.f32 %v111_v54, %v159_v25  ;;  %v534_v13 = vsub.f32 %v112_v55, %v160_v26 }
  0x1e   :  { %v536_v14 = vsub.f32 %v113_v56, %v161_v27  ;;  %v170_v33 = vadd.f32 %v154_v7, %v114_v57  ;;  %v171_v34 = vadd.f32 %v155_v17, %v115_v58  ;;  %v172_v35 = vadd.f32 %v156_v19, %v116_v59 }
  0x1f   :  { %v178_v15 = vadd.f32 %v361_v63, %v122_v28  ;;  %v173_v36 = vadd.f32 %v157_v20, %v117_v60  ;;  %v174_v37 = vadd.f32 %v158_v21, %v118_v61  ;;  %vm186_vm8 = vcmp.gt.f32.partialorder %v516_v41, 0.18625 }
  0x20   :  { %vm187_vm9 = vcmp.gt.f32.partialorder %v518_v24, 0.18625  ;;  %v175_v38 = vadd.f32 %v159_v25, %v119_v62  ;;  %vm188_vm10 = vcmp.gt.f32.partialorder %v523_v43, 0.18625  ;;  %vm189_vm11 = vcmp.gt.f32.partialorder %v525_v9, 0.18625 }
  0x21   :  { %vm190_vm12 = vcmp.gt.f32.partialorder %v527_v10, 0.18625  ;;  %v179_v16 = vadd.f32 %v362_v0, %v123_v29  ;;  %vm191_vm13 = vcmp.gt.f32.partialorder %v532_v12, 0.18625  ;;  %vm192_vm14 = vcmp.gt.f32.partialorder %v534_v13, 0.18625 }
  0x22   :  { %vm193_vm15 = vcmp.gt.f32.partialorder %v536_v14, 0.18625  ;;  %v369_v39 = vsel %vm186_vm8, 1.0, %v396_v8  ;;  %v370_v40 = vsel %vm187_vm9, 1.0, %v396_v8  ;;  %v371_v44 = vsel %vm188_vm10, 1.0, %v396_v8 }
  0x23   :  { %v372_v45 = vsel %vm189_vm11, 1.0, %v396_v8  ;;  %v551_v46 = vsel %vm190_vm12, 1.0, %v396_v8  ;;  %v554_v47 = vsel %vm191_vm13, 1.0, %v396_v8  ;;  %v557_v48 = vsel %vm192_vm14, 1.0, %v396_v8 }
  0x24   :  { %v560_v49 = vsel %vm193_vm15, 1.0, %v396_v8  ;;  %v176_v50 = vadd.f32 %v160_v26, %v120_v18  ;;  %v210_v51 = vmul.f32 0.18625, %v369_v39  ;;  %v211_v52 = vmul.f32 0.18625, %v370_v40 }
  0x25   :  { %v212_v53 = vmul.f32 0.18625, %v371_v44  ;;  %v177_v54 = vadd.f32 %v161_v27, %v121_v22  ;;  %v213_v55 = vmul.f32 0.18625, %v372_v45  ;;  %v214_v56 = vmul.f32 0.18625, %v551_v46 }
  0x26   :  { %v215_v57 = vmul.f32 0.18625, %v554_v47  ;;  %v180_v58 = vadd.f32 %v485_v1, %v124_v23  ;;  %v181_v59 = vadd.f32 %v488_v2, %v125_v30  ;;  %v216_v60 = vmul.f32 0.18625, %v557_v48 }
  0x27   :  { %v217_v61 = vmul.f32 0.18625, %v560_v49  ;;  %v182_v62 = vadd.f32 %v491_v3, %v126_v31  ;;  %v183_v63 = vadd.f32 %v494_v4, %v127_v32  ;;  %v234_v0 = vadd.f32 %v369_v39, %v178_v15 }
  0x28   :  { %v235_v7 = vadd.f32 %v370_v40, %v179_v16  ;;  %v218_v17 = vsub.f32 %v516_v41, %v210_v51  ;;  %v219_v18 = vsub.f32 %v518_v24, %v211_v52  ;;  %v220_v19 = vsub.f32 %v523_v43, %v212_v53 }
  0x29   :  { %v221_v1 = vsub.f32 %v525_v9, %v213_v55  ;;  %v222_v2 = vsub.f32 %v527_v10, %v214_v56  ;;  %v223_v20 = vsub.f32 %v532_v12, %v215_v57  ;;  %v224_v21 = vsub.f32 %v534_v13, %v216_v60 }
  0x2a   :  { %v225_v3 = vsub.f32 %v536_v14, %v217_v61  ;;  %v226_v22 = vadd.f32 %v210_v51, %v170_v33  ;;  %v227_v4 = vadd.f32 %v211_v52, %v171_v34  ;;  %v228_v25 = vadd.f32 %v212_v53, %v172_v35 }
  0x2b   :  { %v229_v26 = vadd.f32 %v213_v55, %v173_v36  ;;  %v230_v27 = vadd.f32 %v214_v56, %v174_v37  ;;  %v231_v28 = vadd.f32 %v215_v57, %v175_v38  ;;  %v232_v29 = vadd.f32 %v216_v60, %v176_v50 }
  0x2c   :  { %v233_v23 = vadd.f32 %v217_v61, %v177_v54  ;;  %v236_v30 = vadd.f32 %v371_v44, %v180_v58  ;;  %vm242_vm0 = vcmp.gt.f32.partialorder %v218_v17, 0.093125  ;;  %vm243_vm1 = vcmp.gt.f32.partialorder %v219_v18, 0.093125 }
  0x2d   :  { %vm244_vm2 = vcmp.gt.f32.partialorder %v220_v19, 0.093125  ;;  %v237_v31 = vadd.f32 %v372_v45, %v181_v59  ;;  %vm245_vm3 = vcmp.gt.f32.partialorder %v221_v1, 0.093125  ;;  %vm246_vm4 = vcmp.gt.f32.partialorder %v222_v2, 0.093125 }
  0x2e   :  { %vm247_vm5 = vcmp.gt.f32.partialorder %v223_v20, 0.093125  ;;  %vm248_vm6 = vcmp.gt.f32.partialorder %v224_v21, 0.093125  ;;  %vm249_vm7 = vcmp.gt.f32.partialorder %v225_v3, 0.093125  ;;  %v238_v55 = vadd.f32 %v551_v46, %v182_v62 }
  0x2f   :  { %v377_v32 = vsel %vm242_vm0, 1.0, %v396_v8  ;;  %v378_v41 = vsel %vm243_vm1, 1.0, %v396_v8  ;;  %v379_v24 = vsel %vm244_vm2, 1.0, %v396_v8  ;;  %v380_v43 = vsel %vm245_vm3, 1.0, %v396_v8 }
  0x30   :  { %v381_v9 = vsel %vm246_vm4, 1.0, %v396_v8  ;;  %v382_v10 = vsel %vm247_vm5, 1.0, %v396_v8  ;;  %v383_v12 = vsel %vm248_vm6, 1.0, %v396_v8  ;;  %v384_v13 = vsel %vm249_vm7, 1.0, %v396_v8 }
  0x31   :  { %v266_v14 = vmul.f32 0.093125, %v377_v32  ;;  %v267_v33 = vmul.f32 0.093125, %v378_v41  ;;  %v268_v34 = vmul.f32 0.093125, %v379_v24  ;;  %v282_v36 = vadd.f32 %v377_v32, %v234_v0 }
  0x32   :  { %v269_v35 = vmul.f32 0.093125, %v380_v43  ;;  %v270_v15 = vmul.f32 0.093125, %v381_v9  ;;  %v271_v37 = vmul.f32 0.093125, %v382_v10  ;;  %v283_v54 = vadd.f32 %v378_v41, %v235_v7 }
  0x33   :  { %v272_v38 = vmul.f32 0.093125, %v383_v12  ;;  %v273_v16 = vmul.f32 0.093125, %v384_v13  ;;  %v274_v39 = vadd.f32 %v266_v14, %v226_v22  ;;  %v275_v40 = vadd.f32 %v267_v33, %v227_v4 }
  0x34   :  { %v276_v44 = vadd.f32 %v268_v34, %v228_v25  ;;  %v277_v45 = vadd.f32 %v269_v35, %v229_v26  ;;  %v278_v50 = vadd.f32 %v270_v15, %v230_v27  ;;  %v279_v51 = vadd.f32 %v271_v37, %v231_v28 }
  0x35   :  { %v280_v52 = vadd.f32 %v272_v38, %v232_v29  ;;  %v281_v53 = vadd.f32 %v273_v16, %v233_v23  ;;  %v184_v8 = vadd.f32 %v497_v5, %v521_v42  ;;  %v284_v56 = vadd.f32 %v379_v24, %v236_v30 }
  0x36   :  { %v185_v57 = vadd.f32 %v500_v6, %v530_v11  ;;  %v239_v58 = vadd.f32 %v554_v47, %v183_v63  ;;  %v389_v59 = vpack.c.bf16 %v275_v40, %v274_v39  ;;  %v390_v60 = vpack.c.bf16 %v277_v45, %v276_v44 }
  0x37   :  { %v285_v61 = vadd.f32 %v380_v43, %v237_v31  ;;  %v391_v0 = vpack.c.bf16 %v279_v51, %v278_v50  ;;  %v392_v17 = vpack.c.bf16 %v281_v53, %v280_v52  ;;  %v318_v18 = vadd.f32 %v283_v54, %v282_v36 }
  0x38   :  { %314 = vst [vmem:[%s610_s1] sm:$0xff] %v389_v59  ;;  %315 = vst [vmem:[%s610_s1 + $0x8] sm:$0xff] %v390_v60  ;;  %v240_v5 = vadd.f32 %v557_v48, %v184_v8  ;;  %v286_v42 = vadd.f32 %v381_v9, %v238_v55  ;;  %v241_v11 = vadd.f32 %v560_v49, %v185_v57 }
  0x39   :  { %316 = vst [vmem:[%s610_s1 + $0x10] sm:$0xff] %v391_v0  ;;  %317 = vst [vmem:[%s610_s1 + $0x18] sm:$0xff] %v392_v17  ;;  %v319_v6 = vadd.f32 %v318_v18, %v284_v56  ;;  %v287_v46 = vadd.f32 %v382_v10, %v239_v58 }
  0x3a   :  { %v288_v62 = vadd.f32 %v383_v12, %v240_v5  ;;  %v289_v7 = vadd.f32 %v384_v13, %v241_v11 }
  0x3b   :  { %v320_v47 = vadd.f32 %v319_v6, %v285_v61 }
  0x3d   :  { %v321_v63 = vadd.f32 %v320_v47, %v286_v42 }
  0x3f   :  { %v322_v19 = vadd.f32 %v321_v63, %v287_v46 }
  0x41   :  { %v323_v1 = vadd.f32 %v322_v19, %v288_v62 }
  0x43   :  { %v324_v48 = vadd.f32 %v323_v1, %v289_v7 }
  0x45   :  { %325 = vadd.xlane.f32.xlu0 %v324_v48 }
  0xd2   :  { %v326_v2 = vpop.xlane.xlu0 %325 }
  0xd3   :  { %v327_v20 = vrot.slane %v326_v2, 4 }
  0xd5   :  { %v328_v21 = vadd.f32 %v327_v20, %v326_v2 }
  0xd7   :  { %v329_v3 = vrot.slane %v328_v21, 2 }
  0xd9   :  { %v330_v22 = vadd.f32 %v329_v3, %v328_v21 }
  0xdb   :  { %v331_v4 = vrot.slane %v330_v22, 1 }
  0xdd   :  { %v332_v25 = vadd.f32 %v331_v4, %v330_v22 }
  0xdf   :  { %393 = vpush %v332_v25 }
 0x110   :  { %s394_s1 = spop %393 }
 0x111   :  { %v334_v26 = vstv %s394_s1 }
 0x112   :  { %336 = vst [vmem:[%s611_s2] sm:$0xff] %v334_v26 }

// kernel: conv_forward.3
= control target key start
LH: loop header
LB: loop body
LE: loop exit
PB: predicated region body
PF: predicated region fallthrough
CT: control target
= control target key end

     0   :  { %vm260_vm0 = vcmask 392192   ;;  %s1271_s1 = inlined_call_operand.vmem [shape: bf16[48,128], index: 1, kind: input, shape index: {}]   ;;  %s1272_s0 = inlined_call_operand.vmem [shape: bf16[512,48], index: 0, kind: input, shape index: {}]   ;;  %s1273_s2 = inlined_call_operand.vmem [shape: f32[512,128], index: 2, kind: output, shape index: {}]  }
   0x1   :  { %v892_v0 = vld [vmem:[%s1271_s1] sm:$0xff]   ;;  %v893_v1 = vld [vmem:[%s1271_s1 + $0x8] sm:$0xff]   ;;  %v894_v2 = vld [vmem:[%s1271_s1 + $0x10] sm:$0xff]  }
   0x2   :  { %816 = vmatprep.subr.bf16.mxu0 %v892_v0  ;;  %886 = vmatprep.subr.bf16.mxu1 %v892_v0  ;;  %v895_v3 = vld [vmem:[%s1272_s0] sm:$0xff]   ;;  %v897_v5 = vld [vmem:[%s1272_s0 + $0x8] sm:$0xff]   ;;  %v899_v7 = vld [vmem:[%s1272_s0 + $0x10] sm:$0xff]  }
   0x3   :  { %817 = vmatpush3.bf16.msra.mxu0 %v892_v0  ;;  %889 = vmatpush3.bf16.msra.mxu1 %v892_v0  ;;  %v896_v4 = vld [vmem:[%s1272_s0 + $0x80] sm:$0xff]   ;;  %v898_v6 = vld [vmem:[%s1272_s0 + $0x88] sm:$0xff]   ;;  %v900_v8 = vld [vmem:[%s1272_s0 + $0x90] sm:$0xff]  }
   0x4   :  { %818 = vmatprep.subr.bf16.mxu0 %v893_v1  ;;  %887 = vmatprep.subr.bf16.mxu1 %v893_v1  ;;  %v901_v9 = vld [vmem:[%s1272_s0 + $0x18] sm:$0xff]   ;;  %v903_v11 = vld [vmem:[%s1272_s0 + $0x20] sm:$0xff]   ;;  %v905_v13 = vld [vmem:[%s1272_s0 + $0x28] sm:$0xff]  }
   0x5   :  { %822 = vmatprep.mubr.msk.bf16.mxu0 %vm260_vm0, %v895_v3  ;;  %854 = vmatprep.mubr.msk.bf16.mxu1 %vm260_vm0, %v896_v4  ;;  %v902_v10 = vld [vmem:[%s1272_s0 + $0x98] sm:$0xff]   ;;  %v904_v12 = vld [vmem:[%s1272_s0 + $0xa0] sm:$0xff]   ;;  %v906_v14 = vld [vmem:[%s1272_s0 + $0xa8] sm:$0xff]  }
   0x6   :  { %v907_v15 = vld [vmem:[%s1272_s0 + $0x30] sm:$0xff]   ;;  %v909_v17 = vld [vmem:[%s1272_s0 + $0x38] sm:$0xff]   ;;  %v911_v19 = vld [vmem:[%s1272_s0 + $0x40] sm:$0xff]  }
   0x7   :  { %819 = vmatpush3.bf16.msra.mxu0 %v893_v1  ;;  %890 = vmatpush3.bf16.msra.mxu1 %v893_v1  ;;  %v908_v16 = vld [vmem:[%s1272_s0 + $0xb0] sm:$0xff]   ;;  %v910_v18 = vld [vmem:[%s1272_s0 + $0xb8] sm:$0xff]   ;;  %v912_v20 = vld [vmem:[%s1272_s0 + $0xc0] sm:$0xff]  }
   0x8   :  { %820 = vmatprep.subr.bf16.mxu0 %v894_v2  ;;  %888 = vmatprep.subr.bf16.mxu1 %v894_v2  ;;  %v913_v21 = vld [vmem:[%s1272_s0 + $0x48] sm:$0xff]   ;;  %v915_v23 = vld [vmem:[%s1272_s0 + $0x50] sm:$0xff]   ;;  %v917_v25 = vld [vmem:[%s1272_s0 + $0x58] sm:$0xff]  }
   0x9   :  { %v914_v22 = vld [vmem:[%s1272_s0 + $0xc8] sm:$0xff]   ;;  %v916_v24 = vld [vmem:[%s1272_s0 + $0xd0] sm:$0xff]   ;;  %v918_v26 = vld [vmem:[%s1272_s0 + $0xd8] sm:$0xff]  }
   0xa   :  { %v919_v27 = vld [vmem:[%s1272_s0 + $0x60] sm:$0xff]   ;;  %v921_v29 = vld [vmem:[%s1272_s0 + $0x68] sm:$0xff]   ;;  %v923_v31 = vld [vmem:[%s1272_s0 + $0x70] sm:$0xff]  }
   0xb   :  { %821 = vmatpush3.bf16.msra.mxu0 %v894_v2  ;;  %891 = vmatpush3.bf16.msra.mxu1 %v894_v2  ;;  %v920_v28 = vld [vmem:[%s1272_s0 + $0xe0] sm:$0xff]   ;;  %v922_v30 = vld [vmem:[%s1272_s0 + $0xe8] sm:$0xff]   ;;  %v924_v32 = vld [vmem:[%s1272_s0 + $0xf0] sm:$0xff]  }
   0xc   :  { %v925_v33 = vld [vmem:[%s1272_s0 + $0x78] sm:$0xff]  }
   0xd   :  { %v926_v34 = vld [vmem:[%s1272_s0 + $0xf8] sm:$0xff]  }
   0xe   :  { %823 = vmatmul.mubr.msk.bf16.vlgmr.msra.gmra.mrb[0].mxu0 %vm260_vm0, %v897_v5  ;;  %855 = vmatmul.mubr.msk.bf16.vlgmr.msra.gmra.mrb[0].mxu1 %vm260_vm0, %v898_v6 }
   0xf   :  { %826 = vmatprep.mubr.msk.bf16.mxu0 %vm260_vm0, %v899_v7  ;;  %858 = vmatprep.mubr.msk.bf16.mxu1 %vm260_vm0, %v900_v8 }
  0x16   :  { %827 = vmatmul.mubr.msk.bf16.gmra.mrb[4].mxu0 %vm260_vm0, %v901_v9  ;;  %859 = vmatmul.mubr.msk.bf16.gmra.mrb[4].mxu1 %vm260_vm0, %v902_v10 }
  0x17   :  { %830 = vmatprep.mubr.msk.bf16.mxu0 %vm260_vm0, %v903_v11  ;;  %862 = vmatprep.mubr.msk.bf16.mxu1 %vm260_vm0, %v904_v12 }
  0x1e   :  { %831 = vmatmul.mubr.msk.bf16.gmra.mrb[8].mxu0 %vm260_vm0, %v905_v13  ;;  %863 = vmatmul.mubr.msk.bf16.gmra.mrb[8].mxu1 %vm260_vm0, %v906_v14 }
  0x1f   :  { %834 = vmatprep.mubr.msk.bf16.mxu0 %vm260_vm0, %v907_v15  ;;  %866 = vmatprep.mubr.msk.bf16.mxu1 %vm260_vm0, %v908_v16 }
  0x26   :  { %835 = vmatmul.mubr.msk.bf16.gmra.mrb[12].mxu0 %vm260_vm0, %v909_v17  ;;  %867 = vmatmul.mubr.msk.bf16.gmra.mrb[12].mxu1 %vm260_vm0, %v910_v18 }
  0x27   :  { %838 = vmatprep.mubr.msk.bf16.mxu0 %vm260_vm0, %v911_v19  ;;  %870 = vmatprep.mubr.msk.bf16.mxu1 %vm260_vm0, %v912_v20 }
  0x2e   :  { %839 = vmatmul.mubr.msk.bf16.gmra.mrb[16].mxu0 %vm260_vm0, %v913_v21  ;;  %871 = vmatmul.mubr.msk.bf16.gmra.mrb[16].mxu1 %vm260_vm0, %v914_v22 }
  0x2f   :  { %842 = vmatprep.mubr.msk.bf16.mxu0 %vm260_vm0, %v915_v23  ;;  %874 = vmatprep.mubr.msk.bf16.mxu1 %vm260_vm0, %v916_v24 }
  0x36   :  { %843 = vmatmul.mubr.msk.bf16.gmra.mrb[20].mxu0 %vm260_vm0, %v917_v25  ;;  %875 = vmatmul.mubr.msk.bf16.gmra.mrb[20].mxu1 %vm260_vm0, %v918_v26 }
  0x37   :  { %846 = vmatprep.mubr.msk.bf16.mxu0 %vm260_vm0, %v919_v27  ;;  %878 = vmatprep.mubr.msk.bf16.mxu1 %vm260_vm0, %v920_v28 }
  0x3e   :  { %847 = vmatmul.mubr.msk.bf16.gmra.mrb[24].mxu0 %vm260_vm0, %v921_v29  ;;  %879 = vmatmul.mubr.msk.bf16.gmra.mrb[24].mxu1 %vm260_vm0, %v922_v30 }
  0x3f   :  { %850 = vmatprep.mubr.msk.bf16.mxu0 %vm260_vm0, %v923_v31  ;;  %882 = vmatprep.mubr.msk.bf16.mxu1 %vm260_vm0, %v924_v32 }
  0x46   :  { %851 = vmatmul.mubr.msk.bf16.gmra.mrb[28].mxu0 %vm260_vm0, %v925_v33  ;;  %883 = vmatmul.mubr.msk.bf16.gmra.mrb[28].mxu1 %vm260_vm0, %v926_v34 }
  0xe1   :  { %v824_v35 = vpop.f32.mrb[0].mxu0  ;;  %v856_v36 = vpop.f32.mrb[0].mxu1 }
  0xe2   :  { %648 = vst [vmem:[%s1273_s2 + $0x10] sm:$0xff] %v824_v35  ;;  %680 = vst [vmem:[%s1273_s2 + $0x110] sm:$0xff] %v856_v36  ;;  %v391_v37 = vpop.f32.mrb[1].mxu0  ;;  %v519_v38 = vpop.f32.mrb[1].mxu1 }
  0xe3   :  { %646 = vst [vmem:[%s1273_s2] sm:$0xff] %v391_v37  ;;  %678 = vst [vmem:[%s1273_s2 + $0x100] sm:$0xff] %v519_v38  ;;  %v825_v39 = vpop.f32.mrb[2].mxu0  ;;  %v857_v40 = vpop.f32.mrb[2].mxu1 }
  0xe4   :  { %649 = vst [vmem:[%s1273_s2 + $0x18] sm:$0xff] %v825_v39  ;;  %681 = vst [vmem:[%s1273_s2 + $0x118] sm:$0xff] %v857_v40  ;;  %v394_v41 = vpop.f32.mrb[3].mxu0  ;;  %v522_v42 = vpop.f32.mrb[3].mxu1 }
  0xe5   :  { %647 = vst [vmem:[%s1273_s2 + $0x8] sm:$0xff] %v394_v41  ;;  %679 = vst [vmem:[%s1273_s2 + $0x108] sm:$0xff] %v522_v42 }
  0xe9   :  { %v828_v43 = vpop.f32.mrb[4].mxu0  ;;  %v860_v44 = vpop.f32.mrb[4].mxu1 }
  0xea   :  { %652 = vst [vmem:[%s1273_s2 + $0x30] sm:$0xff] %v828_v43  ;;  %684 = vst [vmem:[%s1273_s2 + $0x130] sm:$0xff] %v860_v44  ;;  %v407_v45 = vpop.f32.mrb[5].mxu0  ;;  %v535_v46 = vpop.f32.mrb[5].mxu1 }
  0xeb   :  { %650 = vst [vmem:[%s1273_s2 + $0x20] sm:$0xff] %v407_v45  ;;  %682 = vst [vmem:[%s1273_s2 + $0x120] sm:$0xff] %v535_v46  ;;  %v829_v47 = vpop.f32.mrb[6].mxu0  ;;  %v861_v48 = vpop.f32.mrb[6].mxu1 }
  0xec   :  { %653 = vst [vmem:[%s1273_s2 + $0x38] sm:$0xff] %v829_v47  ;;  %685 = vst [vmem:[%s1273_s2 + $0x138] sm:$0xff] %v861_v48  ;;  %v410_v49 = vpop.f32.mrb[7].mxu0  ;;  %v538_v50 = vpop.f32.mrb[7].mxu1 }
  0xed   :  { %651 = vst [vmem:[%s1273_s2 + $0x28] sm:$0xff] %v410_v49  ;;  %683 = vst [vmem:[%s1273_s2 + $0x128] sm:$0xff] %v538_v50 }
  0xf1   :  { %v832_v51 = vpop.f32.mrb[8].mxu0  ;;  %v864_v52 = vpop.f32.mrb[8].mxu1 }
  0xf2   :  { %656 = vst [vmem:[%s1273_s2 + $0x50] sm:$0xff] %v832_v51  ;;  %688 = vst [vmem:[%s1273_s2 + $0x150] sm:$0xff] %v864_v52  ;;  %v423_v53 = vpop.f32.mrb[9].mxu0  ;;  %v551_v54 = vpop.f32.mrb[9].mxu1 }
  0xf3   :  { %654 = vst [vmem:[%s1273_s2 + $0x40] sm:$0xff] %v423_v53  ;;  %686 = vst [vmem:[%s1273_s2 + $0x140] sm:$0xff] %v551_v54  ;;  %v833_v55 = vpop.f32.mrb[10].mxu0  ;;  %v865_v56 = vpop.f32.mrb[10].mxu1 }
  0xf4   :  { %657 = vst [vmem:[%s1273_s2 + $0x58] sm:$0xff] %v833_v55  ;;  %689 = vst [vmem:[%s1273_s2 + $0x158] sm:$0xff] %v865_v56  ;;  %v426_v57 = vpop.f32.mrb[11].mxu0  ;;  %v554_v58 = vpop.f32.mrb[11].mxu1 }
  0xf5   :  { %655 = vst [vmem:[%s1273_s2 + $0x48] sm:$0xff] %v426_v57  ;;  %687 = vst [vmem:[%s1273_s2 + $0x148] sm:$0xff] %v554_v58 }
  0xf9   :  { %v836_v59 = vpop.f32.mrb[12].mxu0  ;;  %v868_v60 = vpop.f32.mrb[12].mxu1 }
  0xfa   :  { %660 = vst [vmem:[%s1273_s2 + $0x70] sm:$0xff] %v836_v59  ;;  %692 = vst [vmem:[%s1273_s2 + $0x170] sm:$0xff] %v868_v60  ;;  %v439_v61 = vpop.f32.mrb[13].mxu0  ;;  %v567_v62 = vpop.f32.mrb[13].mxu1 }
  0xfb   :  { %658 = vst [vmem:[%s1273_s2 + $0x60] sm:$0xff] %v439_v61  ;;  %690 = vst [vmem:[%s1273_s2 + $0x160] sm:$0xff] %v567_v62  ;;  %v837_v63 = vpop.f32.mrb[14].mxu0  ;;  %v869_v0 = vpop.f32.mrb[14].mxu1 }
  0xfc   :  { %661 = vst [vmem:[%s1273_s2 + $0x78] sm:$0xff] %v837_v63  ;;  %693 = vst [vmem:[%s1273_s2 + $0x178] sm:$0xff] %v869_v0  ;;  %v442_v1 = vpop.f32.mrb[15].mxu0  ;;  %v570_v2 = vpop.f32.mrb[15].mxu1 }
  0xfd   :  { %659 = vst [vmem:[%s1273_s2 + $0x68] sm:$0xff] %v442_v1  ;;  %691 = vst [vmem:[%s1273_s2 + $0x168] sm:$0xff] %v570_v2 }
 0x101   :  { %v840_v3 = vpop.f32.mrb[16].mxu0  ;;  %v872_v4 = vpop.f32.mrb[16].mxu1 }
 0x102   :  { %664 = vst [vmem:[%s1273_s2 + $0x90] sm:$0xff] %v840_v3  ;;  %696 = vst [vmem:[%s1273_s2 + $0x190] sm:$0xff] %v872_v4  ;;  %v455_v5 = vpop.f32.mrb[17].mxu0  ;;  %v583_v6 = vpop.f32.mrb[17].mxu1 }
 0x103   :  { %662 = vst [vmem:[%s1273_s2 + $0x80] sm:$0xff] %v455_v5  ;;  %694 = vst [vmem:[%s1273_s2 + $0x180] sm:$0xff] %v583_v6  ;;  %v841_v7 = vpop.f32.mrb[18].mxu0  ;;  %v873_v8 = vpop.f32.mrb[18].mxu1 }
 0x104   :  { %665 = vst [vmem:[%s1273_s2 + $0x98] sm:$0xff] %v841_v7  ;;  %697 = vst [vmem:[%s1273_s2 + $0x198] sm:$0xff] %v873_v8  ;;  %v458_v9 = vpop.f32.mrb[19].mxu0  ;;  %v586_v10 = vpop.f32.mrb[19].mxu1 }
 0x105   :  { %663 = vst [vmem:[%s1273_s2 + $0x88] sm:$0xff] %v458_v9  ;;  %695 = vst [vmem:[%s1273_s2 + $0x188] sm:$0xff] %v586_v10 }
 0x109   :  { %v844_v11 = vpop.f32.mrb[20].mxu0  ;;  %v876_v12 = vpop.f32.mrb[20].mxu1 }
 0x10a   :  { %668 = vst [vmem:[%s1273_s2 + $0xb0] sm:$0xff] %v844_v11  ;;  %700 = vst [vmem:[%s1273_s2 + $0x1b0] sm:$0xff] %v876_v12  ;;  %v471_v13 = vpop.f32.mrb[21].mxu0  ;;  %v599_v14 = vpop.f32.mrb[21].mxu1 }
 0x10b   :  { %666 = vst [vmem:[%s1273_s2 + $0xa0] sm:$0xff] %v471_v13  ;;  %698 = vst [vmem:[%s1273_s2 + $0x1a0] sm:$0xff] %v599_v14  ;;  %v845_v15 = vpop.f32.mrb[22].mxu0  ;;  %v877_v16 = vpop.f32.mrb[22].mxu1 }
 0x10c   :  { %669 = vst [vmem:[%s1273_s2 + $0xb8] sm:$0xff] %v845_v15  ;;  %701 = vst [vmem:[%s1273_s2 + $0x1b8] sm:$0xff] %v877_v16  ;;  %v474_v17 = vpop.f32.mrb[23].mxu0  ;;  %v602_v18 = vpop.f32.mrb[23].mxu1 }
 0x10d   :  { %667 = vst [vmem:[%s1273_s2 + $0xa8] sm:$0xff] %v474_v17  ;;  %699 = vst [vmem:[%s1273_s2 + $0x1a8] sm:$0xff] %v602_v18 }
 0x111   :  { %v848_v19 = vpop.f32.mrb[24].mxu0  ;;  %v880_v20 = vpop.f32.mrb[24].mxu1 }
 0x112   :  { %672 = vst [vmem:[%s1273_s2 + $0xd0] sm:$0xff] %v848_v19  ;;  %704 = vst [vmem:[%s1273_s2 + $0x1d0] sm:$0xff] %v880_v20  ;;  %v487_v21 = vpop.f32.mrb[25].mxu0  ;;  %v615_v22 = vpop.f32.mrb[25].mxu1 }
 0x113   :  { %670 = vst [vmem:[%s1273_s2 + $0xc0] sm:$0xff] %v487_v21  ;;  %702 = vst [vmem:[%s1273_s2 + $0x1c0] sm:$0xff] %v615_v22  ;;  %v849_v23 = vpop.f32.mrb[26].mxu0  ;;  %v881_v24 = vpop.f32.mrb[26].mxu1 }
 0x114   :  { %673 = vst [vmem:[%s1273_s2 + $0xd8] sm:$0xff] %v849_v23  ;;  %705 = vst [vmem:[%s1273_s2 + $0x1d8] sm:$0xff] %v881_v24  ;;  %v490_v25 = vpop.f32.mrb[27].mxu0  ;;  %v618_v26 = vpop.f32.mrb[27].mxu1 }
 0x115   :  { %671 = vst [vmem:[%s1273_s2 + $0xc8] sm:$0xff] %v490_v25  ;;  %703 = vst [vmem:[%s1273_s2 + $0x1c8] sm:$0xff] %v618_v26 }
 0x119   :  { %v852_v27 = vpop.f32.mrb[28].mxu0  ;;  %v884_v28 = vpop.f32.mrb[28].mxu1 }
 0x11a   :  { %676 = vst [vmem:[%s1273_s2 + $0xf0] sm:$0xff] %v852_v27  ;;  %708 = vst [vmem:[%s1273_s2 + $0x1f0] sm:$0xff] %v884_v28  ;;  %v503_v29 = vpop.f32.mrb[29].mxu0  ;;  %v631_v30 = vpop.f32.mrb[29].mxu1 }
 0x11b   :  { %674 = vst [vmem:[%s1273_s2 + $0xe0] sm:$0xff] %v503_v29  ;;  %706 = vst [vmem:[%s1273_s2 + $0x1e0] sm:$0xff] %v631_v30  ;;  %v853_v31 = vpop.f32.mrb[30].mxu0  ;;  %v885_v32 = vpop.f32.mrb[30].mxu1 }
 0x11c   :  { %677 = vst [vmem:[%s1273_s2 + $0xf8] sm:$0xff] %v853_v31  ;;  %709 = vst [vmem:[%s1273_s2 + $0x1f8] sm:$0xff] %v885_v32  ;;  %v506_v33 = vpop.f32.mrb[31].mxu0  ;;  %v634_v34 = vpop.f32.mrb[31].mxu1 }
 0x11d   :  { %675 = vst [vmem:[%s1273_s2 + $0xe8] sm:$0xff] %v506_v33  ;;  %707 = vst [vmem:[%s1273_s2 + $0x1e8] sm:$0xff] %v634_v34 }

</bundles_post_ra>
